<compile_context>
chip_gen: v6e
topology: v6e:2x2x1
jax: 0.10.0
libtpu: 0.0.40
codegen_flags: <defaults>
</compile_context>

<pallas_src>
import functools

import jax
import jax.numpy as jnp
from jax.experimental import pallas as pl
from jax.experimental.pallas import tpu as pltpu

_LANE = 128          # TPU lane width (last dim of a vreg)
_BF16_SUBLANE = 16   # bf16 packs 16 rows per vreg (sublane dim)


def _round_up(n, m):
    return ((n + m - 1) // m) * m


def _cdiv(a, b):
    return -(-a // b)


# --------------------------------------------------------------------------- #
# Kernel
# --------------------------------------------------------------------------- #
def _dqn_kernel(x_ref, w_in_ref, b_in_ref, *rest,
                num_hidden_layers, out_features):
    """One batch tile of the whole MLP forward.

    x_ref:     (TB, Fp)    bf16   (batch-tiled, double-buffered)
    w_in_ref:  (Fp, Hp)    bf16   b_in_ref:  (1, Hp)    f32   (VMEM-resident)
    w_h_ref:   (L, Hp, Hp) bf16   b_h_ref:   (L, 1, Hp) f32   (present iff L>0)
    w_out_ref: (Hp, Op)    bf16   b_out_ref: (1, Op)    f32
    o_ref:     (TB, O)     f32    (exact output width, O == out_features)
    """
    if num_hidden_layers > 0:
        w_h_ref, b_h_ref, w_out_ref, b_out_ref, o_ref = rest
    else:
        w_out_ref, b_out_ref, o_ref = rest

    # Input layer + ReLU (bf16 MXU inputs, f32 accumulation).
    h = jnp.dot(x_ref[...], w_in_ref[...], preferred_element_type=jnp.float32)
    h = jnp.maximum(h + b_in_ref[...], 0.0)

    # Hidden layers + ReLU (statically unrolled; L known at trace time).
    for i in range(num_hidden_layers):
        h = jnp.dot(h.astype(jnp.bfloat16), w_h_ref[i],
                    preferred_element_type=jnp.float32)
        h = jnp.maximum(h + b_h_ref[i], 0.0)      # b_h_ref[i] is a (1, Hp) row

    # Output layer (no activation); store only the real O columns.
    out = jnp.dot(h.astype(jnp.bfloat16), w_out_ref[...],
                  preferred_element_type=jnp.float32)
    out = out + b_out_ref[...]
    o_ref[...] = out[:, :out_features].astype(o_ref.dtype)


# --------------------------------------------------------------------------- #
# One-time parameter preparation (pad + bf16 cast, hoisted out of the forward)
# --------------------------------------------------------------------------- #
def prepare_dqn_params(params):
    """Pad lane dims to 128 and cast weights to bf16 once (cache the result)."""
    w_in, b_in = params["w_in"], params["b_in"]
    w_h, b_h = params["w_h"], params["b_h"]
    w_out, b_out = params["w_out"], params["b_out"]

    F, H = w_in.shape
    O = w_out.shape[1]
    L = w_h.shape[0]
    Fp, Hp, Op = _round_up(F, _LANE), _round_up(H, _LANE), _round_up(O, _LANE)

    f32, bf16 = jnp.float32, jnp.bfloat16
    prepared = {
        "dims": (F, H, O, L, Fp, Hp, Op),
        "w_in": jnp.zeros((Fp, Hp), bf16).at[:F, :H].set(w_in.astype(bf16)),
        "b_in": jnp.zeros((1, Hp), f32).at[:, :H].set(
            b_in.reshape(1, H).astype(f32)),
        "w_out": jnp.zeros((Hp, Op), bf16).at[:H, :O].set(w_out.astype(bf16)),
        "b_out": jnp.zeros((1, Op), f32).at[:, :O].set(
            b_out.reshape(1, O).astype(f32)),
    }
    if L > 0:
        prepared["w_h"] = jnp.zeros((L, Hp, Hp), bf16).at[:, :H, :H].set(
            w_h.astype(bf16))
        prepared["b_h"] = jnp.zeros((L, 1, Hp), f32).at[:, 0, :H].set(
            b_h.reshape(L, H).astype(f32))
    return prepared


# --------------------------------------------------------------------------- #
# Forward pass
# --------------------------------------------------------------------------- #
def _choose_batch_tiling(B, Hp, batch_tile):
    """Pick (TB, Bp, num_tiles): bf16-friendly, balanced, >=2 tiles if possible."""
    if batch_tile is None:
        # Small hidden sizes -> per-tile MXU time is tiny; amortize grid overhead.
        batch_tile = 1024 if Hp <= 256 else 256
    num_tiles = max(1, _cdiv(B, batch_tile))
    # v7x has 2 TensorCores; give the "parallel" axis something to shard when
    # there is enough batch for two full bf16 sublane tiles.
    if num_tiles == 1 and B >= 2 * _BF16_SUBLANE:
        num_tiles = 2
    TB = _round_up(_cdiv(B, num_tiles), _BF16_SUBLANE)
    return TB, TB * num_tiles, num_tiles


def _vmem_limit_bytes(weight_bytes, act_bytes):
    """Generation-aware VMEM budget: >= resident needs, <= ~80% of physical."""
    try:
        cap = pltpu.get_tpu_info().vmem_capacity_bytes
    except Exception:
        cap = 64 << 20   # conservative default (v7x per-TC VMEM)
    needed = weight_bytes + act_bytes + (4 << 20)   # + internal-scratch headroom
    return int(min(max(needed, 16 << 20), (cap * 4) // 5))


def dqn_forward(x, prepared, *, batch_tile=None):
    """DQN forward via a single pallas_call. `prepared` = prepare_dqn_params()."""
    F, H, O, L, Fp, Hp, Op = prepared["dims"]
    B, Fx = x.shape
    assert Fx == F, (Fx, F)

    TB, Bp, num_tiles = _choose_batch_tiling(B, Hp, batch_tile)

    # Only the activations are padded per call (weights were prepared once).
    x_p = jnp.zeros((Bp, Fp), jnp.bfloat16).at[:B, :F].set(
        x.astype(jnp.bfloat16))

    # Whole-array VMEM operands: resident across batch tiles, single-buffered.
    resident = pl.BlockSpec(memory_space=pltpu.MemorySpace.VMEM)

    in_specs = [pl.BlockSpec((TB, Fp), lambda i: (i, 0)),   # batch-tiled x
                resident, resident]
    args = [x_p, prepared["w_in"], prepared["b_in"]]
    if L > 0:   # skip zero-extent hidden stacks
        in_specs += [resident, resident]
        args += [prepared["w_h"], prepared["b_h"]]
    in_specs += [resident, resident]
    args += [prepared["w_out"], prepared["b_out"]]

    # Exact-width output block (full last dim is legal) -> minimal writeback.
    out_spec = pl.BlockSpec((TB, O), lambda i: (i, 0))

    # Advisory cost estimate for the XLA scheduler.
    flops = 2 * Bp * (Fp * Hp + L * Hp * Hp + Hp * Op)
    weight_bytes = (Fp * Hp + L * Hp * Hp + Hp * Op) * 2 \
        + ((L + 1) * Hp + Op) * 4
    act_bytes = 2 * (TB * Fp * 2 + TB * O * 4) + TB * Hp * 4
    bytes_accessed = weight_bytes + Bp * Fp * 2 + Bp * O * 4

    kernel = functools.partial(_dqn_kernel,
                               num_hidden_layers=L, out_features=O)

    out_p = pl.pallas_call(
        kernel,
        out_shape=jax.ShapeDtypeStruct((Bp, O), jnp.float32),
        grid=(num_tiles,),
        in_specs=in_specs,
        out_specs=out_spec,
        compiler_params=pltpu.CompilerParams(
            dimension_semantics=("parallel",),
            vmem_limit_bytes=_vmem_limit_bytes(weight_bytes, act_bytes)),
        cost_estimate=pl.CostEstimate(flops=flops, transcendentals=0,
                                      bytes_accessed=bytes_accessed),
    )(*args)

    return out_p[:B]


# --------------------------------------------------------------------------- #
# Params init + pure-JAX reference
# --------------------------------------------------------------------------- #
def init_dqn_params(key, inputs, outputs, num_hidden, hidden_size):
    """Deterministic synthetic init matching nn.Linear shapes.

    PyTorch nn.Linear(in, out) stores weight (out, in); we keep the transposed
    (in, out) layout so the kernel computes x @ W + b.
    """
    ks = jax.random.split(key, 2 * (num_hidden + 1))
    scale = 0.1

    w_in = scale * jax.random.normal(ks[0], (inputs, hidden_size), jnp.float32)
    b_in = scale * jax.random.normal(ks[1], (1, hidden_size), jnp.float32)

    num_hidden_layers = num_hidden - 1
    w_h_list, b_h_list = [], []
    for i in range(num_hidden_layers):
        w_h_list.append(scale * jax.random.normal(
            ks[2 + 2 * i], (hidden_size, hidden_size), jnp.float32))
        b_h_list.append(scale * jax.random.normal(
            ks[3 + 2 * i], (hidden_size,), jnp.float32))
    if num_hidden_layers > 0:
        w_h = jnp.stack(w_h_list)                     # (L, H, H)
        b_h = jnp.stack(b_h_list)                     # (L, H)
    else:
        w_h = jnp.zeros((0, hidden_size, hidden_size), jnp.float32)
        b_h = jnp.zeros((0, hidden_size), jnp.float32)

    w_out = scale * jax.random.normal(
        ks[-2], (hidden_size, outputs), jnp.float32)
    b_out = scale * jax.random.normal(ks[-1], (1, outputs), jnp.float32)

    return {"w_in": w_in, "b_in": b_in, "w_h": w_h, "b_h": b_h,
            "w_out": w_out, "b_out": b_out}


def dqn_reference(x, params):
    """Pure-JAX f32 reference matching the PyTorch forward semantics."""
    h = jnp.maximum(x @ params["w_in"] + params["b_in"], 0.0)
    for i in range(params["w_h"].shape[0]):
        h = jnp.maximum(h @ params["w_h"][i] + params["b_h"][i][None, :], 0.0)
    return h @ params["w_out"] + params["b_out"]


if __name__ == "__main__":
    # Small shapes consistent with the module: DQN(inputs=4, outputs=2,
    # num_hidden=3, hidden_size=32) on a batch of 2 observations.
    batch, inputs, outputs, num_hidden, hidden_size = 2, 4, 2, 3, 32

    key = jax.random.PRNGKey(0)
    k_x, k_p = jax.random.split(key)
    x = jax.random.normal(k_x, (batch, inputs), jnp.float32)
    params = init_dqn_params(k_p, inputs, outputs, num_hidden, hidden_size)

    prepared = prepare_dqn_params(params)     # pad/cast weights once
    out = dqn_forward(x, prepared)
    out = jax.block_until_ready(out)

    ref = dqn_reference(x, params)
    assert out.shape == (batch, outputs), out.shape
    # bf16 MXU inputs with f32 accumulation -> loose-but-meaningful tolerance.
    # Note: bf16 weights can flip argmax over near-tied Q-values vs f32 torch.
    assert jnp.allclose(out, ref, atol=2e-2, rtol=2e-2), (out, ref)

    print("KERNEL_OK")
</pallas_src>

<mosaic_0001>
module attributes {stable_mosaic.version = 11 : i64} {
  func.func @_dqn_kernel(%arg0: i32, %arg1: memref<16x128xbf16, #tpu.memory_space<vmem>>, %arg2: memref<128x128xbf16, #tpu.memory_space<vmem>>, %arg3: memref<1x128xf32, #tpu.memory_space<vmem>>, %arg4: memref<2x128x128xbf16, #tpu.memory_space<vmem>>, %arg5: memref<2x1x128xf32, #tpu.memory_space<vmem>>, %arg6: memref<128x128xbf16, #tpu.memory_space<vmem>>, %arg7: memref<1x128xf32, #tpu.memory_space<vmem>>, %arg8: memref<16x2xf32, #tpu.memory_space<vmem>>) attributes {dimension_semantics = [#tpu.dimension_semantics<parallel>], iteration_bounds = array<i64: 1>, scalar_prefetch = 0 : i64, scratch_operands = 0 : i64, tpu.core_type = #tpu.core_type<tc>, window_params = [{transform_indices = @transform_0, window_bounds = array<i64: 16, 128>}, {pipeline_mode = #tpu.pipeline_mode<synchronous>, transform_indices = @transform_1, window_bounds = array<i64: 128, 128>}, {pipeline_mode = #tpu.pipeline_mode<synchronous>, transform_indices = @transform_2, window_bounds = array<i64: 1, 128>}, {pipeline_mode = #tpu.pipeline_mode<synchronous>, transform_indices = @transform_3, window_bounds = array<i64: 2, 128, 128>}, {pipeline_mode = #tpu.pipeline_mode<synchronous>, transform_indices = @transform_4, window_bounds = array<i64: 2, 1, 128>}, {pipeline_mode = #tpu.pipeline_mode<synchronous>, transform_indices = @transform_5, window_bounds = array<i64: 128, 128>}, {pipeline_mode = #tpu.pipeline_mode<synchronous>, transform_indices = @transform_6, window_bounds = array<i64: 1, 128>}, {transform_indices = @transform_7, window_bounds = array<i64: 16, 2>}]} {
    %c0 = arith.constant 0 : index
    %c0_0 = arith.constant 0 : index
    %0 = vector.load %arg1[%c0, %c0_0] : memref<16x128xbf16, #tpu.memory_space<vmem>>, vector<16x128xbf16>
    %c0_1 = arith.constant 0 : index
    %c0_2 = arith.constant 0 : index
    %1 = vector.load %arg2[%c0_1, %c0_2] : memref<128x128xbf16, #tpu.memory_space<vmem>>, vector<128x128xbf16>
    %cst = arith.constant dense<0.000000e+00> : vector<16x128xf32>
    %2 = tpu.matmul %0, %1, %cst {dimension_numbers = #tpu.dot_dimension_numbers<[1], [0], [0], [1], [0, 0, 1, 1], [], []>} : vector<16x128xbf16>, vector<128x128xbf16>, vector<16x128xf32> -> vector<16x128xf32>
    %c0_3 = arith.constant 0 : index
    %c0_4 = arith.constant 0 : index
    %3 = vector.load %arg3[%c0_3, %c0_4] : memref<1x128xf32, #tpu.memory_space<vmem>>, vector<1x128xf32>
    %4 = vector.broadcast %3 : vector<1x128xf32> to vector<16x128xf32>
    %5 = arith.addf %2, %4 : vector<16x128xf32>
    %cst_5 = arith.constant 0.000000e+00 : f32
    %6 = vector.broadcast %cst_5 : f32 to vector<16x128xf32>
    %7 = arith.maximumf %5, %6 : vector<16x128xf32>
    %8 = arith.truncf %7 : vector<16x128xf32> to vector<16x128xbf16>
    %c0_6 = arith.constant 0 : index
    %c0_7 = arith.constant 0 : index
    %c0_8 = arith.constant 0 : index
    %9 = vector.load %arg4[%c0_6, %c0_7, %c0_8] : memref<2x128x128xbf16, #tpu.memory_space<vmem>>, vector<1x128x128xbf16>
    %10 = vector.shape_cast %9 : vector<1x128x128xbf16> to vector<128x128xbf16>
    %cst_9 = arith.constant dense<0.000000e+00> : vector<16x128xf32>
    %11 = tpu.matmul %8, %10, %cst_9 {dimension_numbers = #tpu.dot_dimension_numbers<[1], [0], [0], [1], [0, 0, 1, 1], [], []>} : vector<16x128xbf16>, vector<128x128xbf16>, vector<16x128xf32> -> vector<16x128xf32>
    %c0_10 = arith.constant 0 : index
    %c0_11 = arith.constant 0 : index
    %c0_12 = arith.constant 0 : index
    %12 = vector.load %arg5[%c0_10, %c0_11, %c0_12] : memref<2x1x128xf32, #tpu.memory_space<vmem>>, vector<1x1x128xf32>
    %13 = vector.shape_cast %12 : vector<1x1x128xf32> to vector<1x128xf32>
    %14 = vector.broadcast %13 : vector<1x128xf32> to vector<16x128xf32>
    %15 = arith.addf %11, %14 : vector<16x128xf32>
    %cst_13 = arith.constant 0.000000e+00 : f32
    %16 = vector.broadcast %cst_13 : f32 to vector<16x128xf32>
    %17 = arith.maximumf %15, %16 : vector<16x128xf32>
    %18 = arith.truncf %17 : vector<16x128xf32> to vector<16x128xbf16>
    %c1 = arith.constant 1 : index
    %c0_14 = arith.constant 0 : index
    %c0_15 = arith.constant 0 : index
    %19 = vector.load %arg4[%c1, %c0_14, %c0_15] : memref<2x128x128xbf16, #tpu.memory_space<vmem>>, vector<1x128x128xbf16>
    %20 = vector.shape_cast %19 : vector<1x128x128xbf16> to vector<128x128xbf16>
    %cst_16 = arith.constant dense<0.000000e+00> : vector<16x128xf32>
    %21 = tpu.matmul %18, %20, %cst_16 {dimension_numbers = #tpu.dot_dimension_numbers<[1], [0], [0], [1], [0, 0, 1, 1], [], []>} : vector<16x128xbf16>, vector<128x128xbf16>, vector<16x128xf32> -> vector<16x128xf32>
    %c1_17 = arith.constant 1 : index
    %c0_18 = arith.constant 0 : index
    %c0_19 = arith.constant 0 : index
    %22 = vector.load %arg5[%c1_17, %c0_18, %c0_19] : memref<2x1x128xf32, #tpu.memory_space<vmem>>, vector<1x1x128xf32>
    %23 = vector.shape_cast %22 : vector<1x1x128xf32> to vector<1x128xf32>
    %24 = vector.broadcast %23 : vector<1x128xf32> to vector<16x128xf32>
    %25 = arith.addf %21, %24 : vector<16x128xf32>
    %cst_20 = arith.constant 0.000000e+00 : f32
    %26 = vector.broadcast %cst_20 : f32 to vector<16x128xf32>
    %27 = arith.maximumf %25, %26 : vector<16x128xf32>
    %28 = arith.truncf %27 : vector<16x128xf32> to vector<16x128xbf16>
    %c0_21 = arith.constant 0 : index
    %c0_22 = arith.constant 0 : index
    %29 = vector.load %arg6[%c0_21, %c0_22] : memref<128x128xbf16, #tpu.memory_space<vmem>>, vector<128x128xbf16>
    %cst_23 = arith.constant dense<0.000000e+00> : vector<16x128xf32>
    %30 = tpu.matmul %28, %29, %cst_23 {dimension_numbers = #tpu.dot_dimension_numbers<[1], [0], [0], [1], [0, 0, 1, 1], [], []>} : vector<16x128xbf16>, vector<128x128xbf16>, vector<16x128xf32> -> vector<16x128xf32>
    %c0_24 = arith.constant 0 : index
    %c0_25 = arith.constant 0 : index
    %31 = vector.load %arg7[%c0_24, %c0_25] : memref<1x128xf32, #tpu.memory_space<vmem>>, vector<1x128xf32>
    %32 = vector.broadcast %31 : vector<1x128xf32> to vector<16x128xf32>
    %33 = arith.addf %30, %32 : vector<16x128xf32>
    %34 = vector.extract_strided_slice %33 {offsets = [0, 0], sizes = [16, 2], strides = [1, 1]} : vector<16x128xf32> to vector<16x2xf32>
    %c0_26 = arith.constant 0 : index
    %c0_27 = arith.constant 0 : index
    %35 = vector.load %arg8[%c0_26, %c0_27] : memref<16x2xf32, #tpu.memory_space<vmem>>, vector<16x2xf32>
    tpu.vector_store %arg8[%c0_26, %c0_27], %34 {strides = array<i32>} : memref<16x2xf32, #tpu.memory_space<vmem>>, vector<16x2xf32>,
    return
  }
  func.func @transform_0(%arg0: i32) -> (i32, i32) {
    %c0_i32 = arith.constant 0 : i32
    %c0_i32_0 = arith.constant 0 : i32
    return %arg0, %c0_i32 : i32, i32
  }
  func.func @transform_1(%arg0: i32) -> (i32, i32) {
    %c0_i32 = arith.constant 0 : i32
    %c0_i32_0 = arith.constant 0 : i32
    %c0_i32_1 = arith.constant 0 : i32
    return %c0_i32, %c0_i32_0 : i32, i32
  }
  func.func @transform_2(%arg0: i32) -> (i32, i32) {
    %c0_i32 = arith.constant 0 : i32
    %c0_i32_0 = arith.constant 0 : i32
    %c0_i32_1 = arith.constant 0 : i32
    return %c0_i32, %c0_i32_0 : i32, i32
  }
  func.func @transform_3(%arg0: i32) -> (i32, i32, i32) {
    %c0_i32 = arith.constant 0 : i32
    %c0_i32_0 = arith.constant 0 : i32
    %c0_i32_1 = arith.constant 0 : i32
    %c0_i32_2 = arith.constant 0 : i32
    return %c0_i32, %c0_i32_0, %c0_i32_1 : i32, i32, i32
  }
  func.func @transform_4(%arg0: i32) -> (i32, i32, i32) {
    %c0_i32 = arith.constant 0 : i32
    %c0_i32_0 = arith.constant 0 : i32
    %c0_i32_1 = arith.constant 0 : i32
    %c0_i32_2 = arith.constant 0 : i32
    return %c0_i32, %c0_i32_0, %c0_i32_1 : i32, i32, i32
  }
  func.func @transform_5(%arg0: i32) -> (i32, i32) {
    %c0_i32 = arith.constant 0 : i32
    %c0_i32_0 = arith.constant 0 : i32
    %c0_i32_1 = arith.constant 0 : i32
    return %c0_i32, %c0_i32_0 : i32, i32
  }
  func.func @transform_6(%arg0: i32) -> (i32, i32) {
    %c0_i32 = arith.constant 0 : i32
    %c0_i32_0 = arith.constant 0 : i32
    %c0_i32_1 = arith.constant 0 : i32
    return %c0_i32, %c0_i32_0 : i32, i32
  }
  func.func @transform_7(%arg0: i32) -> (i32, i32) {
    %c0_i32 = arith.constant 0 : i32
    %c0_i32_0 = arith.constant 0 : i32
    return %arg0, %c0_i32 : i32, i32
  }
}

</mosaic_0001>

<bundles_post_ra>
// kernel: tpu_custom_call.1
= control target key start
LH: loop header
LB: loop body
LE: loop exit
PB: predicated region body
PF: predicated region fallthrough
CT: control target
= control target key end

     0   :  { %12 = vsyncpa [#allocation3], 0  ;;  %s970_s0 = inlined_call_operand.hbm [shape: bf16[16,128], index: 0, kind: input, shape index: {}]   ;;  %s971_s1 = inlined_call_operand.hbm [shape: bf16[128,128], index: 1, kind: input, shape index: {}]   ;;  %s972_s2 = inlined_call_operand.vmem [shape: f32[1,128], index: 2, kind: input, shape index: {}]   ;;  %s973_s3 = inlined_call_operand.hbm [shape: bf16[2,128,128], index: 3, kind: input, shape index: {}]   ;;  %s974_s4 = inlined_call_operand.vmem [shape: f32[2,1,128], index: 4, kind: input, shape index: {}]   ;;  %s975_s5 = inlined_call_operand.hbm [shape: bf16[128,128], index: 5, kind: input, shape index: {}]   ;;  %s976_s6 = inlined_call_operand.vmem [shape: f32[1,128], index: 6, kind: input, shape index: {}]   ;;  %s977_s7 = inlined_call_operand.vmem [shape: f32[16,2], index: 7, kind: output, shape index: {}]  }
   0x1   :  { %13 = vsyncpa [#allocation5], 0 }
   0x2   :  { %14 = vsyncpa [#allocation8], 0  ;;  %s840_s24 = smov [#allocation4]   ;;  %s841_s26 = smov [#allocation2]  }
   0x3   :  { %s32_s25 = sshll.u32 %s840_s24, 4  ;;  %s20_s27 = sshll.u32 %s841_s26, 4  ;;  %s33_s25 = int_to_ptr.vmem [resolvable:$true] %s32_s25  ;;  %s21_s27 = int_to_ptr.vmem [resolvable:$true] %s20_s27 }
   0x4   :  { %s762_s28 = scalar_lea.vmem %s33_s25, 1024  ;;  %p767_p1 = scmp.lt.s32.totalorder %s33_s25, %s33_s25 }
   0x5   :  { %p763_p0 = scmp.ne.s32.totalorder %s33_s25, %s762_s28  ;;  %p768_p2 = scmp.lt.s32.totalorder %s762_s28, %s762_s28 }
   0x7   :  { %p769_p3 = por %p768_p2, %p767_p1 }
   0x9   :  { %p770_p4 = pnand %p769_p3, %p763_p0 }
   0xb   :  { %773 = shalt.err (!%p770_p4)
}
   0xc   :  { %s842_s29 = smov 64   ;;  %s843_s30 = smov 4  }
   0xd   :  { %38 = dma.hbm_to_vmem [thread:$0]  %s971_s1, 1024, %s33_s25, [#allocation5], %s842_s29, %s842_s29, %s843_s30  }
   0xe   :  { %s782_s10 = scalar_lea.vmem %s21_s27, 128  ;;  %p787_p6 = scmp.lt.s32.totalorder %s21_s27, %s21_s27 }
   0xf   :  { %p783_p5 = scmp.ne.s32.totalorder %s21_s27, %s782_s10  ;;  %p788_p7 = scmp.lt.s32.totalorder %s782_s10, %s782_s10 }
  0x11   :  { %p789_p8 = por %p788_p7, %p787_p6 }
  0x13   :  { %p790_p9 = pnand %p789_p8, %p783_p5 }
  0x15   :  { %793 = shalt.err (!%p790_p9)
}
  0x16   :  { %26 = dma.hbm_to_vmem [thread:$0]  %s970_s0, 128, %s21_s27, [#allocation3], %s842_s29, %s842_s29, %s843_s30  }
  0x17   :  { %s844_s13 = smov [#allocation6]   ;;  %s845_s15 = smov [#allocation7]  }
  0x18   :  { %s46_s14 = sshll.u32 %s844_s13, 4  ;;  %s60_s16 = sshll.u32 %s845_s15, 4  ;;  %s47_s14 = int_to_ptr.vmem [resolvable:$true] %s46_s14  ;;  %s61_s16 = int_to_ptr.vmem [resolvable:$true] %s60_s16 }
  0x19   :  { %s802_s1 = scalar_lea.vmem %s47_s14, 2048  ;;  %p807_p11 = scmp.lt.s32.totalorder %s47_s14, %s47_s14 }
  0x1a   :  { %p803_p10 = scmp.ne.s32.totalorder %s47_s14, %s802_s1  ;;  %p808_p12 = scmp.lt.s32.totalorder %s802_s1, %s802_s1 }
  0x1c   :  { %p809_p13 = por %p808_p12, %p807_p11 }
  0x1e   :  { %p810_p0 = pnand %p809_p13, %p803_p10 }
  0x20   :  { %813 = shalt.err (!%p810_p0)
}
  0x21   :  { %52 = dma.hbm_to_vmem [thread:$0]  %s973_s3, 2048, %s47_s14, [#allocation5], %s842_s29, %s842_s29, %s843_s30  }
  0x22   :  { %s822_s0 = scalar_lea.vmem %s61_s16, 1024  ;;  %p827_p2 = scmp.lt.s32.totalorder %s61_s16, %s61_s16 }
  0x23   :  { %p823_p1 = scmp.ne.s32.totalorder %s61_s16, %s822_s0  ;;  %p828_p3 = scmp.lt.s32.totalorder %s822_s0, %s822_s0 }
  0x25   :  { %p829_p4 = por %p828_p3, %p827_p2 }
  0x27   :  { %p830_p5 = pnand %p829_p4, %p823_p1 }
  0x29   :  { %833 = shalt.err (!%p830_p5)
}
  0x2a   :  { %66 = dma.hbm_to_vmem [thread:$0]  %s975_s5, 1024, %s61_s16, [#allocation8], %s842_s29, %s842_s29, %s843_s30  }
  0x2b   :  { %834 = dma.done.wait [#allocation3], 128  }
  0x2c   :  { %835 = vsyncadd [#allocation3], 4294967168 }
  0x2d   :  { %836 = dma.done.wait [#allocation5], 3072  }
  0x2e   :  { %837 = vsyncadd [#allocation5], 4294964224 }
  0x2f   :  { %838 = dma.done.wait [#allocation8], 1024  }
  0x30   :  { %839 = vsyncadd [#allocation8], 4294966272  ;;  %v846_v0 = vmov 0.0   ;;  %vm847_vm0 = vmmov 0   ;;  %v721_v1 = vld [vmem:[#allocation4 + $0x38] sm:$0xff]   ;;  %v722_v2 = vld [vmem:[#allocation4 + $0x30] sm:$0xff]  }
  0x31   :  { %633 = vmatprep.subr.bf16.mxu0 %v846_v0  ;;  %649 = vmatprep.mubr.msk.bf16.mxu0 %vm847_vm0, %v846_v0  ;;  %v723_v3 = vld [vmem:[#allocation4 + $0x28] sm:$0xff]   ;;  %v730_v4 = vld [vmem:[#allocation6 + $0x38] sm:$0xff]   ;;  %v724_v5 = vld [vmem:[#allocation4 + $0x20] sm:$0xff]   ;;  %vm549_vm1 = vcmask 15360  }
  0x32   :  { %653 = vmatprep.subr.bf16.mxu1 %v846_v0  ;;  %669 = vmatprep.mubr.msk.bf16.mxu1 %vm847_vm0, %v846_v0  ;;  %v731_v6 = vld [vmem:[#allocation6 + $0x30] sm:$0xff]   ;;  %v725_v7 = vld [vmem:[#allocation4 + $0x18] sm:$0xff]   ;;  %v732_v8 = vld [vmem:[#allocation6 + $0x28] sm:$0xff]  }
  0x33   :  { %634 = vmatpush3.bf16.msra.mxu0 %v721_v1  ;;  %654 = vmatpush3.bf16.msra.mxu1 %v730_v4  ;;  %v726_v9 = vld [vmem:[#allocation4 + $0x10] sm:$0xff]   ;;  %v733_v10 = vld [vmem:[#allocation6 + $0x20] sm:$0xff]   ;;  %v727_v11 = vld [vmem:[#allocation4 + $0x8] sm:$0xff]  }
  0x34   :  { %635 = vmatprep.subr.bf16.mxu0 %v846_v0  ;;  %655 = vmatprep.subr.bf16.mxu1 %v846_v0  ;;  %v734_v12 = vld [vmem:[#allocation6 + $0x18] sm:$0xff]   ;;  %v728_v13 = vld [vmem:[#allocation4] sm:$0xff]   ;;  %v735_v15 = vld [vmem:[#allocation6 + $0x10] sm:$0xff]  }
  0x35   :  { %v729_v14 = vld [vmem:[#allocation2] sm:$0xff]   ;;  %v736_v16 = vld [vmem:[#allocation6 + $0x8] sm:$0xff]   ;;  %v737_v17 = vld [vmem:[#allocation6] sm:$0xff]  }
  0x36   :  { %v738_v18 = vld [vmem:[#allocation6 + $0x78] sm:$0xff]   ;;  %v739_v19 = vld [vmem:[#allocation6 + $0x70] sm:$0xff]   ;;  %v740_v20 = vld [vmem:[#allocation6 + $0x68] sm:$0xff]  }
  0x37   :  { %636 = vmatpush3.bf16.msra.mxu0 %v722_v2  ;;  %656 = vmatpush3.bf16.msra.mxu1 %v731_v6  ;;  %v741_v21 = vld [vmem:[#allocation6 + $0x60] sm:$0xff]   ;;  %v742_v22 = vld [vmem:[#allocation6 + $0x58] sm:$0xff]   ;;  %v743_v33 = vld [vmem:[#allocation6 + $0x50] sm:$0xff]  }
  0x38   :  { %637 = vmatprep.subr.bf16.mxu0 %v846_v0  ;;  %657 = vmatprep.subr.bf16.mxu1 %v846_v0  ;;  %v559_v23 = vld [vmem:[%s972_s2] ss:$0 sm:$0xff]  ;;  %v744_v34 = vld [vmem:[#allocation6 + $0x48] sm:$0xff]   ;;  %v745_v35 = vld [vmem:[#allocation6 + $0x40] sm:$0xff]  }
  0x39   :  { %v746_v36 = vld [vmem:[#allocation7 + $0x38] sm:$0xff]   ;;  %v747_v37 = vld [vmem:[#allocation7 + $0x30] sm:$0xff]   ;;  %v748_v38 = vld [vmem:[#allocation7 + $0x28] sm:$0xff]  }
  0x3a   :  { %v749_v39 = vld [vmem:[#allocation7 + $0x20] sm:$0xff]   ;;  %v750_v40 = vld [vmem:[#allocation7 + $0x18] sm:$0xff]   ;;  %v751_v51 = vld [vmem:[#allocation7 + $0x10] sm:$0xff]  }
  0x3b   :  { %638 = vmatpush3.bf16.msra.mxu0 %v723_v3  ;;  %658 = vmatpush3.bf16.msra.mxu1 %v732_v8  ;;  %v569_v41 = vld [vmem:[%s974_s4] ss:$0 sm:$0xff]  ;;  %v752_v52 = vld [vmem:[#allocation7 + $0x8] sm:$0xff]   ;;  %v753_v53 = vld [vmem:[#allocation7] sm:$0xff]  }
  0x3c   :  { %639 = vmatprep.subr.bf16.mxu0 %v846_v0  ;;  %659 = vmatprep.subr.bf16.mxu1 %v846_v0  ;;  %v579_v54 = vld [vmem:[%s974_s4 + $0x1] ss:$0 sm:$0xff] }
  0x3f   :  { %640 = vmatpush3.bf16.msra.mxu0 %v724_v5  ;;  %660 = vmatpush3.bf16.msra.mxu1 %v733_v10 }
  0x40   :  { %641 = vmatprep.subr.bf16.mxu0 %v846_v0  ;;  %661 = vmatprep.subr.bf16.mxu1 %v846_v0 }
  0x43   :  { %642 = vmatpush3.bf16.msra.mxu0 %v725_v7  ;;  %662 = vmatpush3.bf16.msra.mxu1 %v734_v12 }
  0x44   :  { %643 = vmatprep.subr.bf16.mxu0 %v846_v0  ;;  %663 = vmatprep.subr.bf16.mxu1 %v846_v0 }
  0x47   :  { %644 = vmatpush3.bf16.msra.mxu0 %v726_v9  ;;  %664 = vmatpush3.bf16.msra.mxu1 %v735_v15 }
  0x48   :  { %645 = vmatprep.subr.bf16.mxu0 %v846_v0  ;;  %665 = vmatprep.subr.bf16.mxu1 %v846_v0 }
  0x4b   :  { %646 = vmatpush3.bf16.msra.mxu0 %v727_v11  ;;  %666 = vmatpush3.bf16.msra.mxu1 %v736_v16 }
  0x4c   :  { %647 = vmatprep.subr.bf16.mxu0 %v846_v0  ;;  %667 = vmatprep.subr.bf16.mxu1 %v846_v0 }
  0x4f   :  { %648 = vmatpush3.bf16.msra.mxu0 %v728_v13  ;;  %668 = vmatpush3.bf16.msra.mxu1 %v737_v17 }
  0x50   :  { %673 = vmatprep.subr.bf16.mxu0 %v846_v0  ;;  %693 = vmatprep.subr.bf16.mxu1 %v846_v0 }
  0x52   :  { %650 = vmatmul.mubr.bf16.vlgmr.msra.gmra.mxu0 %v729_v14 }
  0x53   :  { %689 = vmatprep.mubr.msk.bf16.mxu0 %vm847_vm0, %v846_v0  ;;  %674 = vmatpush3.bf16.msra.mxu0 %v738_v18 }
  0x54   :  { %675 = vmatprep.subr.bf16.mxu0 %v846_v0 }
  0x57   :  { %676 = vmatpush3.bf16.msra.mxu0 %v739_v19 }
  0x58   :  { %677 = vmatprep.subr.bf16.mxu0 %v846_v0 }
  0x5b   :  { %678 = vmatpush3.bf16.msra.mxu0 %v740_v20 }
  0x5c   :  { %679 = vmatprep.subr.bf16.mxu0 %v846_v0 }
  0x5f   :  { %680 = vmatpush3.bf16.msra.mxu0 %v741_v21 }
  0x60   :  { %681 = vmatprep.subr.bf16.mxu0 %v846_v0 }
  0x63   :  { %682 = vmatpush3.bf16.msra.mxu0 %v742_v22 }
  0x64   :  { %683 = vmatprep.subr.bf16.mxu0 %v846_v0 }
  0x67   :  { %684 = vmatpush3.bf16.msra.mxu0 %v743_v33 }
  0x68   :  { %685 = vmatprep.subr.bf16.mxu0 %v846_v0 }
  0x6b   :  { %686 = vmatpush3.bf16.msra.mxu0 %v744_v34 }
  0x6c   :  { %687 = vmatprep.subr.bf16.mxu0 %v846_v0 }
  0x6f   :  { %688 = vmatpush3.bf16.msra.mxu0 %v745_v35 }
 0x112   :  { %v195_v24 = vpop.f32.mrf.mxu0 }
 0x113   :  { %v196_v26 = vadd.f32 %v559_v23, %v195_v24 }
 0x114   :  { %v651_v25 = vpop.f32.mrf.mxu0 }
 0x115   :  { %v202_v30 = vmax.f32 %v196_v26, 0.0 }
 0x116   :  { %v198_v27 = vpop.f32.mrf.mxu0 }
 0x117   :  { %v199_v28 = vadd.f32 %v559_v23, %v198_v27 }
 0x118   :  { %v652_v29 = vpop.f32.mrf.mxu0 }
 0x119   :  { %v203_v31 = vmax.f32 %v199_v28, 0.0 }
 0x11b   :  { %v204_v32 = vpack.c.bf16 %v203_v31, %v202_v30 }
 0x11d   :  { %670 = vmatmul.mubr.bf16.vlgmr.msra.gmra.mxu1 %v204_v32 }
 0x11e   :  { %709 = vmatprep.mubr.msk.bf16.mxu1 %vm847_vm0, %v846_v0  ;;  %694 = vmatpush3.bf16.msra.mxu1 %v746_v36 }
 0x11f   :  { %695 = vmatprep.subr.bf16.mxu1 %v846_v0 }
 0x122   :  { %696 = vmatpush3.bf16.msra.mxu1 %v747_v37 }
 0x123   :  { %697 = vmatprep.subr.bf16.mxu1 %v846_v0 }
 0x126   :  { %698 = vmatpush3.bf16.msra.mxu1 %v748_v38 }
 0x127   :  { %699 = vmatprep.subr.bf16.mxu1 %v846_v0 }
 0x12a   :  { %700 = vmatpush3.bf16.msra.mxu1 %v749_v39 }
 0x12b   :  { %701 = vmatprep.subr.bf16.mxu1 %v846_v0 }
 0x12e   :  { %702 = vmatpush3.bf16.msra.mxu1 %v750_v40 }
 0x12f   :  { %703 = vmatprep.subr.bf16.mxu1 %v846_v0 }
 0x132   :  { %704 = vmatpush3.bf16.msra.mxu1 %v751_v51 }
 0x133   :  { %705 = vmatprep.subr.bf16.mxu1 %v846_v0 }
 0x136   :  { %706 = vmatpush3.bf16.msra.mxu1 %v752_v52 }
 0x137   :  { %707 = vmatprep.subr.bf16.mxu1 %v846_v0  ;;  %v588_v0 = vld [vmem:[%s976_s6] ss:$0 sm:$0xff] }
 0x13a   :  { %708 = vmatpush3.bf16.msra.mxu1 %v753_v53 }
 0x1dd   :  { %v310_v42 = vpop.f32.mrf.mxu1 }
 0x1de   :  { %v311_v44 = vadd.f32 %v569_v41, %v310_v42 }
 0x1df   :  { %v671_v43 = vpop.f32.mrf.mxu1 }
 0x1e0   :  { %v317_v48 = vmax.f32 %v311_v44, 0.0 }
 0x1e1   :  { %v313_v45 = vpop.f32.mrf.mxu1 }
 0x1e2   :  { %v314_v46 = vadd.f32 %v569_v41, %v313_v45 }
 0x1e3   :  { %v672_v47 = vpop.f32.mrf.mxu1 }
 0x1e4   :  { %v318_v49 = vmax.f32 %v314_v46, 0.0 }
 0x1e6   :  { %v319_v50 = vpack.c.bf16 %v318_v49, %v317_v48 }
 0x1e8   :  { %690 = vmatmul.mubr.bf16.vlgmr.msra.gmra.mxu0 %v319_v50 }
 0x2a8   :  { %v427_v55 = vpop.f32.mrf.mxu0 }
 0x2a9   :  { %v428_v57 = vadd.f32 %v579_v54, %v427_v55 }
 0x2aa   :  { %v691_v56 = vpop.f32.mrf.mxu0 }
 0x2ab   :  { %v434_v61 = vmax.f32 %v428_v57, 0.0 }
 0x2ac   :  { %v430_v58 = vpop.f32.mrf.mxu0 }
 0x2ad   :  { %v431_v59 = vadd.f32 %v579_v54, %v430_v58 }
 0x2ae   :  { %v692_v60 = vpop.f32.mrf.mxu0 }
 0x2af   :  { %v435_v62 = vmax.f32 %v431_v59, 0.0 }
 0x2b1   :  { %v436_v63 = vpack.c.bf16 %v435_v62, %v434_v61 }
 0x2b3   :  { %710 = vmatmul.mubr.bf16.vlgmr.msra.gmra.mxu1 %v436_v63 }
 0x373   :  { %v542_v1 = vpop.f32.mrf.mxu1 }
 0x374   :  { %v543_v2 = vadd.f32 %v588_v0, %v542_v1 }
 0x375   :  { %v711_v3 = vpop.f32.mrf.mxu1 }
 0x376   :  { %550 = vst.msk [vmem:[%s977_s7] sm:$0xff] %vm549_vm1, %v543_v2 }
 0x377   :  { %v545_v4 = vpop.f32.mrf.mxu1 }
 0x378   :  { %v546_v5 = vadd.f32 %v588_v0, %v545_v4 }
 0x379   :  { %v712_v6 = vpop.f32.mrf.mxu1 }
 0x37a   :  { %551 = vst.msk [vmem:[%s977_s7 + $0x8] sm:$0xff] %vm549_vm1, %v546_v5 }
 0x37b   :  { %556 = vsyncpa [#allocation3], 1 }
 0x37c   :  { %557 = vsyncpa [#allocation5], 1 }
 0x37d   :  { %558 = vsyncpa [#allocation8], 1 }

</bundles_post_ra>
